<compile_context>
chip_gen: v6e
topology: v6e:2x2x1
jax: 0.10.0
libtpu: 0.0.40
codegen_flags: <defaults>
</compile_context>

<pallas_src>
import functools

import jax
import jax.numpy as jnp
import numpy as np
from jax.experimental import pallas as pl
from jax.experimental.pallas import tpu as pltpu


LANE = 128                        # vreg lane width -> channel padding unit
_ROW_TILE = 512                   # output-row (node) tile
_SRC_TILE = 1024                  # source-node reduction tile (A_hat columns)
_RESIDENT_XW_MAX_BYTES = 8 << 20  # keep XW resident in VMEM if (double-buffered) it fits


def _round_up(x, m):
    return ((x + m - 1) // m) * m


def _largest_divisor_tile(dim, candidates=(512, 256, 128)):
    for c in candidates:
        if dim % c == 0:
            return c
    return dim


def _compiler_params(vmem_limit_bytes=None):
    kw = dict(dimension_semantics=("parallel", "arbitrary"))
    if vmem_limit_bytes is not None:
        kw["vmem_limit_bytes"] = int(vmem_limit_bytes)
    return pltpu.CompilerParams(**kw)


# ---------------------------------------------------------------------------
# Pallas kernels
# ---------------------------------------------------------------------------
def xw_kernel(x_ref, w_ref, o_ref, acc_ref):
    """Tiled feature transform XW = X @ W (bf16 in, f32 accumulate, bf16 out)."""
    @pl.when(pl.program_id(1) == 0)
    def _():
        acc_ref[...] = jnp.zeros_like(acc_ref)

    acc_ref[...] += jnp.dot(x_ref[...], w_ref[...],
                            preferred_element_type=jnp.float32)

    @pl.when(pl.program_id(1) == pl.num_programs(1) - 1)
    def _():
        o_ref[...] = acc_ref[...].astype(o_ref.dtype)


def agg_kernel(cols_ref, cnt_ref, a_ref, xw_ref, b_ref, o_ref, acc_ref, *,
               max_nt, tk, num_col_tiles, resident_xw, final, valid_cols):
    """Block-sparse aggregation: out = epilogue(A_hat @ XW + b).

    Grid = (row tiles, max nonzero column tiles per row).  cols_ref / cnt_ref are the
    scalar-prefetched (SMEM) compacted column-tile indices / per-row counts.  Steps with
    k >= cnt_ref[i] are skipped (their A_hat index_map repeats the previous block index,
    so no new DMA is issued, and the accumulate is gated off).
    """
    i = pl.program_id(0)
    k = pl.program_id(1)

    @pl.when(k == 0)
    def _():
        acc_ref[...] = jnp.zeros_like(acc_ref)

    @pl.when(k < cnt_ref[i])
    def _():
        if resident_xw:
            if num_col_tiles == 1:
                xw = xw_ref[...]
            else:
                j = cols_ref[i * max_nt + k]
                start = pl.multiple_of(j * tk, tk)
                xw = xw_ref[pl.ds(start, tk), :]
        else:
            xw = xw_ref[...]
        acc_ref[...] += jnp.dot(a_ref[...], xw, preferred_element_type=jnp.float32)

    @pl.when(k == pl.num_programs(1) - 1)
    def _():
        h = acc_ref[...] + b_ref[...]          # f32 epilogue (v5e has no bf16 VPU)
        if final:
            # Mask lanes added by channel padding so they do not pollute max / sum.
            # (-1e30 is safe because h / acc / out stay f32.)
            col = jax.lax.broadcasted_iota(jnp.int32, h.shape, 1)
            h = jnp.where(col < valid_cols, h, jnp.float32(-1e30))
            m = jnp.max(h, axis=-1, keepdims=True)
            z = h - m
            s = jnp.sum(jnp.exp(z), axis=-1, keepdims=True)   # exp on EUP
            o_ref[...] = (z - jnp.log(s)).astype(o_ref.dtype)
        else:
            o_ref[...] = jnp.maximum(h, 0.0).astype(o_ref.dtype)
    # TODO(synk): training-mode dropout would use pltpu.prng_seed /
    # pltpu.stateful_bernoulli in this epilogue; eval mode => identity.


# ---------------------------------------------------------------------------
# pallas_call wrappers
# ---------------------------------------------------------------------------
def _xw_call(x_bf16, w_bf16, tm):
    n, c_in = x_bf16.shape
    c_out = w_bf16.shape[1]
    tkc = _largest_divisor_tile(c_in)
    grid = (n // tm, c_in // tkc)
    return pl.pallas_call(
        xw_kernel,
        out_shape=jax.ShapeDtypeStruct((n, c_out), jnp.bfloat16),
        grid_spec=pltpu.PrefetchScalarGridSpec(
            num_scalar_prefetch=0,
            grid=grid,
            in_specs=[
                pl.BlockSpec((tm, tkc), lambda i, k: (i, k)),
                pl.BlockSpec((tkc, c_out), lambda i, k: (k, 0)),
            ],
            out_specs=pl.BlockSpec((tm, c_out), lambda i, k: (i, 0)),
            scratch_shapes=[pltpu.VMEM((tm, c_out), jnp.float32)],
        ),
        compiler_params=_compiler_params(),
    )(x_bf16, w_bf16)


def _agg_call(a_bf16, xw_bf16, b_f32, cols, cnt, *, tm, tk, max_nt,
              final, valid_cols, out_dtype):
    n_pad = a_bf16.shape[0]
    c_out = xw_bf16.shape[1]
    num_rt = n_pad // tm
    num_ct = n_pad // tk
    # Keep XW resident in VMEM for the whole call (constant block index -> one DMA)
    # when it fits the budget; otherwise stream (tk, c_out) panels via the sparse map.
    resident = (2 * n_pad * c_out * 2) <= _RESIDENT_XW_MAX_BYTES

    kernel = functools.partial(
        agg_kernel, max_nt=max_nt, tk=tk, num_col_tiles=num_ct,
        resident_xw=resident, final=final, valid_cols=valid_cols)

    a_spec = pl.BlockSpec(
        (tm, tk), lambda i, k, cols_r, cnt_r: (i, cols_r[i * max_nt + k]))
    if resident:
        xw_spec = pl.BlockSpec((n_pad, c_out), lambda i, k, cols_r, cnt_r: (0, 0))
    else:
        xw_spec = pl.BlockSpec(
            (tk, c_out), lambda i, k, cols_r, cnt_r: (cols_r[i * max_nt + k], 0))
    b_spec = pl.BlockSpec((1, c_out), lambda i, k, cols_r, cnt_r: (0, 0))
    out_spec = pl.BlockSpec((tm, c_out), lambda i, k, cols_r, cnt_r: (i, 0))

    out_bytes = 4 if out_dtype == jnp.float32 else 2
    vmem_need = (2 * tm * tk * 2                                          # A double buffer
                 + (2 * n_pad * c_out * 2 if resident else 2 * tk * c_out * 2)
                 + 2 * tm * c_out * out_bytes                             # out double buffer
                 + tm * c_out * 4                                         # f32 accumulator
                 + 2 * c_out * 4)                                         # bias
    # 32 MiB floor (above every chip's scoped default), 48 MiB cap (inside v7x's 64 MiB).
    vmem_limit = min(max(2 * vmem_need, 32 << 20), 48 << 20)

    return pl.pallas_call(
        kernel,
        out_shape=jax.ShapeDtypeStruct((n_pad, c_out), out_dtype),
        grid_spec=pltpu.PrefetchScalarGridSpec(
            num_scalar_prefetch=2,
            grid=(num_rt, max_nt),
            in_specs=[a_spec, xw_spec, b_spec],
            out_specs=out_spec,
            scratch_shapes=[pltpu.VMEM((tm, c_out), jnp.float32)],
        ),
        compiler_params=_compiler_params(vmem_limit),
    )(cols, cnt, a_bf16, xw_bf16, b_f32)


# ---------------------------------------------------------------------------
# Glue: normalized adjacency + block-sparse metadata + parameters + forward driver
# ---------------------------------------------------------------------------
def gcn_normalized_adjacency(edge_index, num_nodes):
    """Dense A_hat = D^{-1/2} (A + I) D^{-1/2}, A_hat[target, source] += 1."""
    src = edge_index[0]
    dst = edge_index[1]
    a = jnp.zeros((num_nodes, num_nodes), jnp.float32)
    a = a.at[dst, src].add(1.0)                       # messages flow source -> target
    a = a + jnp.eye(num_nodes, dtype=jnp.float32)     # add self loops
    deg = jnp.sum(a, axis=1)
    dinv = jnp.where(deg > 0, 1.0 / jnp.sqrt(deg), 0.0)
    return dinv[:, None] * a * dinv[None, :]


def _block_sparse_meta(a_np, tm, tk):
    """Host-side compaction of nonzero (tm, tk) A_hat tiles per row tile."""
    n_pad = a_np.shape[0]
    num_rt, num_ct = n_pad // tm, n_pad // tk
    nz = a_np.reshape(num_rt, tm, num_ct, tk).any(axis=(1, 3))
    cnt = nz.sum(axis=1).astype(np.int32)
    max_nt = max(int(cnt.max()), 1)
    cols = np.zeros((num_rt, max_nt), np.int32)
    for r in range(num_rt):
        idxs = np.flatnonzero(nz[r])
        if idxs.size == 0:
            idxs = np.zeros((1,), np.int64)
        cols[r, :idxs.size] = idxs
        cols[r, idxs.size:] = idxs[-1]   # repeated block index -> no new DMA when skipped
    return jnp.asarray(cols.reshape(-1)), jnp.asarray(cnt), max_nt


def init_gcn_params(key, in_channels, hidden_channels, out_channels, num_layers):
    """Deterministic synthetic parameters matching the module's shapes."""
    dims = [in_channels] + [hidden_channels] * (num_layers - 1) + [out_channels]
    params = {"convs": [], "bns": []}
    for i in range(num_layers):
        key, kw, kg, kb = jax.random.split(key, 4)
        c_in, c_out = dims[i], dims[i + 1]
        w = jax.random.normal(kw, (c_in, c_out), jnp.float32) * (1.0 / jnp.sqrt(c_in))
        b = jnp.zeros((1, c_out), jnp.float32)
        params["convs"].append((w, b))
        if i < num_layers - 1:  # BatchNorm1d(hidden_channels) per hidden layer
            gamma = 1.0 + 0.1 * jax.random.normal(kg, (1, c_out), jnp.float32)
            beta = 0.1 * jax.random.normal(kb, (1, c_out), jnp.float32)
            run_mean = jnp.zeros((1, c_out), jnp.float32)
            run_var = jnp.ones((1, c_out), jnp.float32)
            params["bns"].append((gamma, beta, run_mean, run_var))
    return params


def _pad2(x, rows, cols):
    r, c = x.shape
    return jnp.pad(x, ((0, rows - r), (0, cols - c)))


def gcn_forward(x, a_hat, params):
    """Eval-mode GCN forward.  Not jitted at the top level: the block-sparse tile
    structure of A_hat is computed host-side once and fixes the Pallas grids."""
    eps = 1e-5
    convs = params["convs"]
    bns = params["bns"]
    n, c_in = x.shape
    c_out_final = convs[-1][0].shape[1]

    # Adaptive node padding + tile selection (small graphs pad only to a multiple of 8).
    if n <= _ROW_TILE:
        n_pad = _round_up(n, 8)
    else:
        n_pad = _round_up(n, max(_ROW_TILE, _SRC_TILE))
    tm = min(_ROW_TILE, n_pad)
    tk = min(_SRC_TILE, n_pad)

    a_f32 = _pad2(a_hat, n_pad, n_pad)
    cols, cnt, max_nt = _block_sparse_meta(np.asarray(a_f32), tm, tk)
    a_pad = a_f32.astype(jnp.bfloat16)
    h = _pad2(x, n_pad, _round_up(c_in, LANE)).astype(jnp.bfloat16)

    # TODO(synk): the per-layer (XW, aggregate) pair could be fused into a single
    # pallas_call with h resident in VMEM; and A_hat could be stored fp8 (v7x) /
    # int8 (v5e/v6e) to halve HBM traffic of the dominant stream.
    for i in range(len(convs) - 1):
        w, b = convs[i]
        gamma, beta, run_mean, run_var = bns[i]
        # Fold eval-mode BN into the weights/bias (exact since BN is applied after
        # the bias add and A_hat@ is row-linear): b' = b*scale + shift.
        scale = gamma / jnp.sqrt(run_var + eps)
        w_f = w * scale
        b_f = b * scale + (beta - run_mean * scale)
        c_h_pad = _round_up(w.shape[1], LANE)
        w_p = _pad2(w_f, h.shape[1], c_h_pad).astype(jnp.bfloat16)
        b_p = _pad2(b_f, 1, c_h_pad).astype(jnp.float32)
        xw = _xw_call(h, w_p, tm)
        h = _agg_call(a_pad, xw, b_p, cols, cnt, tm=tm, tk=tk, max_nt=max_nt,
                      final=False, valid_cols=c_h_pad, out_dtype=jnp.bfloat16)
        # dropout: identity in eval mode

    w, b = convs[-1]
    c_out_pad = _round_up(c_out_final, LANE)
    w_p = _pad2(w, h.shape[1], c_out_pad).astype(jnp.bfloat16)
    b_p = _pad2(b, 1, c_out_pad).astype(jnp.float32)
    xw = _xw_call(h, w_p, tm)
    out_pad = _agg_call(a_pad, xw, b_p, cols, cnt, tm=tm, tk=tk, max_nt=max_nt,
                        final=True, valid_cols=c_out_final, out_dtype=jnp.float32)
    return out_pad[:n, :c_out_final]


def gcn_reference(x, a_hat, params):
    """Pure-JAX reference mirroring the kernel's bf16 rounding, for validation."""
    eps = 1e-5
    f32 = lambda t: t.astype(jnp.float32)
    bf = lambda t: t.astype(jnp.bfloat16)
    hi = jax.lax.Precision.HIGHEST
    a = f32(bf(a_hat))
    h = f32(bf(x))
    convs, bns = params["convs"], params["bns"]
    for i in range(len(convs) - 1):
        w, b = convs[i]
        gamma, beta, run_mean, run_var = bns[i]
        scale = gamma / jnp.sqrt(run_var + eps)
        w_f = f32(bf(w * scale))
        b_f = b * scale + (beta - run_mean * scale)
        xw = f32(bf(jnp.dot(h, w_f, precision=hi)))
        h = f32(bf(jnp.maximum(jnp.dot(a, xw, precision=hi) + b_f, 0.0)))
    w, b = convs[-1]
    xw = f32(bf(jnp.dot(h, f32(bf(w)), precision=hi)))
    logits = jnp.dot(a, xw, precision=hi) + b
    return jax.nn.log_softmax(logits, axis=-1)


if __name__ == "__main__":
    # Small, forward-consistent shapes.
    num_nodes = 16
    in_channels = 8
    hidden_channels = 32
    out_channels = 8
    num_layers = 3
    dropout = 0.5  # unused in eval mode

    key = jax.random.PRNGKey(0)
    k_x, k_p = jax.random.split(key)

    # Node features [N, C_in]
    x = jax.random.normal(k_x, (num_nodes, in_channels), jnp.float32)

    # Deterministic graph: bidirectional ring -> edge_index [2, 2N]
    idx = jnp.arange(num_nodes)
    nxt = (idx + 1) % num_nodes
    edge_index = jnp.stack(
        [jnp.concatenate([idx, nxt]), jnp.concatenate([nxt, idx])], axis=0
    ).astype(jnp.int32)

    a_hat = gcn_normalized_adjacency(edge_index, num_nodes)
    params = init_gcn_params(k_p, in_channels, hidden_channels, out_channels, num_layers)

    out = gcn_forward(x, a_hat, params)
    out = jax.block_until_ready(out)

    assert out.shape == (num_nodes, out_channels)
    # log_softmax rows must sum to ~1 in probability space
    assert bool(jnp.all(jnp.abs(jnp.sum(jnp.exp(out), axis=-1) - 1.0) < 1e-3))
    # match the pure-JAX reference (same bf16 rounding) within a loose tolerance
    ref = gcn_reference(x, a_hat, params)
    assert bool(jnp.max(jnp.abs(out - ref)) < 2e-2), float(jnp.max(jnp.abs(out - ref)))
    print("KERNEL_OK")
</pallas_src>

<mosaic_0001>
module attributes {stable_mosaic.version = 11 : i64} {
  func.func @xw_kernel(%arg0: i32, %arg1: i32, %arg2: memref<16x128xbf16, #tpu.memory_space<vmem>>, %arg3: memref<128x128xbf16, #tpu.memory_space<vmem>>, %arg4: memref<16x128xbf16, #tpu.memory_space<vmem>>, %arg5: memref<16x128xf32, #tpu.memory_space<vmem>>) attributes {dimension_semantics = [#tpu.dimension_semantics<parallel>, #tpu.dimension_semantics<arbitrary>], iteration_bounds = array<i64: 1, 1>, scalar_prefetch = 0 : i64, scratch_operands = 1 : i64, tpu.core_type = #tpu.core_type<tc>, window_params = [{transform_indices = @transform_0, window_bounds = array<i64: 16, 128>}, {transform_indices = @transform_1, window_bounds = array<i64: 128, 128>}, {transform_indices = @transform_2, window_bounds = array<i64: 16, 128>}]} {
    %c0_i32 = arith.constant 0 : i32
    %0 = arith.cmpi eq, %arg1, %c0_i32 : i32
    %1 = arith.extui %0 : i1 to i32
    %c0_i32_0 = arith.constant 0 : i32
    %2 = arith.cmpi ne, %1, %c0_i32_0 : i32
    scf.if %2 {
      %cst_10 = arith.constant 0.000000e+00 : f32
      %12 = vector.broadcast %cst_10 : f32 to vector<16x128xf32>
      %c0_11 = arith.constant 0 : index
      %c0_12 = arith.constant 0 : index
      %13 = vector.load %arg5[%c0_11, %c0_12] : memref<16x128xf32, #tpu.memory_space<vmem>>, vector<16x128xf32>
      tpu.vector_store %arg5[%c0_11, %c0_12], %12 {strides = array<i32>} : memref<16x128xf32, #tpu.memory_space<vmem>>, vector<16x128xf32>,
    } else {
    }
    %c0 = arith.constant 0 : index
    %c0_1 = arith.constant 0 : index
    %3 = vector.load %arg5[%c0, %c0_1] : memref<16x128xf32, #tpu.memory_space<vmem>>, vector<16x128xf32>
    %c0_2 = arith.constant 0 : index
    %c0_3 = arith.constant 0 : index
    %4 = vector.load %arg2[%c0_2, %c0_3] : memref<16x128xbf16, #tpu.memory_space<vmem>>, vector<16x128xbf16>
    %c0_4 = arith.constant 0 : index
    %c0_5 = arith.constant 0 : index
    %5 = vector.load %arg3[%c0_4, %c0_5] : memref<128x128xbf16, #tpu.memory_space<vmem>>, vector<128x128xbf16>
    %cst = arith.constant dense<0.000000e+00> : vector<16x128xf32>
    %6 = tpu.matmul %4, %5, %cst {dimension_numbers = #tpu.dot_dimension_numbers<[1], [0], [0], [1], [0, 0, 1, 1], [], []>} : vector<16x128xbf16>, vector<128x128xbf16>, vector<16x128xf32> -> vector<16x128xf32>
    %7 = arith.addf %3, %6 : vector<16x128xf32>
    %c0_6 = arith.constant 0 : index
    %c0_7 = arith.constant 0 : index
    %8 = vector.load %arg5[%c0_6, %c0_7] : memref<16x128xf32, #tpu.memory_space<vmem>>, vector<16x128xf32>
    tpu.vector_store %arg5[%c0_6, %c0_7], %7 {strides = array<i32>} : memref<16x128xf32, #tpu.memory_space<vmem>>, vector<16x128xf32>,
    %c0_i32_8 = arith.constant 0 : i32
    %9 = arith.cmpi eq, %arg1, %c0_i32_8 : i32
    %10 = arith.extui %9 : i1 to i32
    %c0_i32_9 = arith.constant 0 : i32
    %11 = arith.cmpi ne, %10, %c0_i32_9 : i32
    scf.if %11 {
      %c0_10 = arith.constant 0 : index
      %c0_11 = arith.constant 0 : index
      %12 = vector.load %arg5[%c0_10, %c0_11] : memref<16x128xf32, #tpu.memory_space<vmem>>, vector<16x128xf32>
      %13 = arith.truncf %12 : vector<16x128xf32> to vector<16x128xbf16>
      %c0_12 = arith.constant 0 : index
      %c0_13 = arith.constant 0 : index
      %14 = vector.load %arg4[%c0_12, %c0_13] : memref<16x128xbf16, #tpu.memory_space<vmem>>, vector<16x128xbf16>
      tpu.vector_store %arg4[%c0_12, %c0_13], %13 {strides = array<i32>} : memref<16x128xbf16, #tpu.memory_space<vmem>>, vector<16x128xbf16>,
    } else {
    }
    return
  }
  func.func @transform_0(%arg0: i32, %arg1: i32) -> (i32, i32) {
    %c0_i32 = arith.constant 0 : i32
    return %arg0, %arg1 : i32, i32
  }
  func.func @transform_1(%arg0: i32, %arg1: i32) -> (i32, i32) {
    %c0_i32 = arith.constant 0 : i32
    %c0_i32_0 = arith.constant 0 : i32
    return %arg1, %c0_i32 : i32, i32
  }
  func.func @transform_2(%arg0: i32, %arg1: i32) -> (i32, i32) {
    %c0_i32 = arith.constant 0 : i32
    %c0_i32_0 = arith.constant 0 : i32
    return %arg0, %c0_i32 : i32, i32
  }
}

</mosaic_0001>

<bundles_post_ra>
// kernel: tpu_custom_call.1
= control target key start
LH: loop header
LB: loop body
LE: loop exit
PB: predicated region body
PF: predicated region fallthrough
CT: control target
= control target key end

     0   :  { %7 = vsyncpa [#allocation4], 0  ;;  %s368_s0 = inlined_call_operand.hbm [shape: bf16[16,128], index: 0, kind: input, shape index: {}]   ;;  %s369_s1 = inlined_call_operand.hbm [shape: bf16[128,128], index: 1, kind: input, shape index: {}]   ;;  %s370_s2 = inlined_call_operand.hbm [shape: bf16[16,128], index: 2, kind: output, shape index: {}]  }
   0x1   :  { %8 = vsyncpa [#allocation7], 0 }
   0x2   :  { %9 = vsyncpa [#allocation5], 0  ;;  %s328_s9 = smov [#allocation3]  }
   0x3   :  { %s15_s10 = sshll.u32 %s328_s9, 4  ;;  %s16_s10 = int_to_ptr.vmem [resolvable:$true] %s15_s10 }
   0x4   :  { %s270_s11 = scalar_lea.vmem %s16_s10, 128  ;;  %p275_p1 = scmp.lt.s32.totalorder %s16_s10, %s16_s10 }
   0x5   :  { %p271_p0 = scmp.ne.s32.totalorder %s16_s10, %s270_s11  ;;  %p276_p2 = scmp.lt.s32.totalorder %s270_s11, %s270_s11 }
   0x7   :  { %p277_p3 = por %p276_p2, %p275_p1 }
   0x9   :  { %p278_p4 = pnand %p277_p3, %p271_p0 }
   0xb   :  { %281 = shalt.err (!%p278_p4)
}
   0xc   :  { %s329_s12 = smov 64   ;;  %s330_s13 = smov 4  }
   0xd   :  { %21 = dma.hbm_to_vmem [thread:$0]  %s368_s0, 128, %s16_s10, [#allocation4], %s329_s12, %s329_s12, %s330_s13  }
   0xe   :  { %s331_s16 = smov [#allocation6]  }
   0xf   :  { %s27_s17 = sshll.u32 %s331_s16, 4  ;;  %s28_s17 = int_to_ptr.vmem [resolvable:$true] %s27_s17 }
  0x10   :  { %s290_s18 = scalar_lea.vmem %s28_s17, 1024  ;;  %p295_p6 = scmp.lt.s32.totalorder %s28_s17, %s28_s17 }
  0x11   :  { %p291_p5 = scmp.ne.s32.totalorder %s28_s17, %s290_s18  ;;  %p296_p7 = scmp.lt.s32.totalorder %s290_s18, %s290_s18 }
  0x13   :  { %p297_p8 = por %p296_p7, %p295_p6 }
  0x15   :  { %p298_p9 = pnand %p297_p8, %p291_p5 }
  0x17   :  { %301 = shalt.err (!%p298_p9)
}
  0x18   :  { %33 = dma.hbm_to_vmem [thread:$0]  %s369_s1, 1024, %s28_s17, [#allocation7], %s329_s12, %s329_s12, %s330_s13  }
  0x19   :  { %322 = dma.done.wait [#allocation4], 128  }
  0x1a   :  { %323 = vsyncadd [#allocation4], 4294967168 }
  0x1b   :  { %324 = dma.done.wait [#allocation7], 1024  }
  0x1c   :  { %325 = vsyncadd [#allocation7], 4294966272  ;;  %v332_v0 = vmov 0.0   ;;  %vm333_vm0 = vmmov 0   ;;  %v253_v1 = vld [vmem:[#allocation6 + $0x38] sm:$0xff]   ;;  %v254_v2 = vld [vmem:[#allocation6 + $0x30] sm:$0xff]  }
  0x1d   :  { %226 = vmatprep.subr.bf16.mxu0 %v332_v0  ;;  %242 = vmatprep.mubr.msk.bf16.mxu0 %vm333_vm0, %v332_v0  ;;  %v255_v3 = vld [vmem:[#allocation6 + $0x28] sm:$0xff]   ;;  %v256_v4 = vld [vmem:[#allocation6 + $0x20] sm:$0xff]   ;;  %v257_v5 = vld [vmem:[#allocation6 + $0x18] sm:$0xff]   ;;  %s334_s0 = smov [#allocation8]  }
  0x1e   :  { %227 = vmatpush3.bf16.msra.mxu0 %v253_v1  ;;  %v258_v6 = vld [vmem:[#allocation6 + $0x10] sm:$0xff]   ;;  %v259_v7 = vld [vmem:[#allocation6 + $0x8] sm:$0xff]   ;;  %v260_v8 = vld [vmem:[#allocation6] sm:$0xff]   ;;  %s186_s1 = sshll.u32 %s334_s0, 4  ;;  %s187_s1 = int_to_ptr.vmem [resolvable:$true] %s186_s1 }
  0x1f   :  { %228 = vmatprep.subr.bf16.mxu0 %v332_v0  ;;  %v261_v9 = vld [vmem:[#allocation3] sm:$0xff]   ;;  %s302_s21 = scalar_lea.vmem %s187_s1, 128  ;;  %p307_p11 = scmp.lt.s32.totalorder %s187_s1, %s187_s1 }
  0x20   :  { %p303_p10 = scmp.ne.s32.totalorder %s187_s1, %s302_s21  ;;  %p308_p12 = scmp.lt.s32.totalorder %s302_s21, %s302_s21 }
  0x22   :  { %229 = vmatpush3.bf16.msra.mxu0 %v254_v2  ;;  %p309_p13 = por %p308_p12, %p307_p11 }
  0x23   :  { %230 = vmatprep.subr.bf16.mxu0 %v332_v0 }
  0x24   :  { %p310_p0 = pnand %p309_p13, %p303_p10 }
  0x26   :  { %231 = vmatpush3.bf16.msra.mxu0 %v255_v3 }
  0x27   :  { %232 = vmatprep.subr.bf16.mxu0 %v332_v0 }
  0x2a   :  { %233 = vmatpush3.bf16.msra.mxu0 %v256_v4 }
  0x2b   :  { %234 = vmatprep.subr.bf16.mxu0 %v332_v0 }
  0x2e   :  { %235 = vmatpush3.bf16.msra.mxu0 %v257_v5 }
  0x2f   :  { %236 = vmatprep.subr.bf16.mxu0 %v332_v0 }
  0x32   :  { %237 = vmatpush3.bf16.msra.mxu0 %v258_v6 }
  0x33   :  { %238 = vmatprep.subr.bf16.mxu0 %v332_v0 }
  0x36   :  { %239 = vmatpush3.bf16.msra.mxu0 %v259_v7 }
  0x37   :  { %240 = vmatprep.subr.bf16.mxu0 %v332_v0 }
  0x3a   :  { %241 = vmatpush3.bf16.msra.mxu0 %v260_v8 }
  0x3d   :  { %243 = vmatmul.mubr.bf16.vlgmr.msra.gmra.mxu0 %v261_v9 }
  0xfd   :  { %v155_v10 = vpop.f32.mrf.mxu0 }
  0xff   :  { %v244_v11 = vpop.f32.mrf.mxu0 }
 0x101   :  { %v158_v12 = vpop.f32.mrf.mxu0 }
 0x102   :  { %v215_v13 = vpack.c.bf16 %v158_v12, %v155_v10 }
 0x103   :  { %v245_v14 = vpop.f32.mrf.mxu0 }
 0x104   :  { %216 = vst [vmem:[#allocation8] sm:$0xff] %v215_v13  }
 0x105   :  { %313 = shalt.err (!%p310_p0)
}
 0x106   :  { %192 = dma.vmem_to_hbm [thread:$0]  %s187_s1, 128, %s370_s2, [#allocation5], %s329_s12, %s329_s12, %s330_s13  }
 0x107   :  { %326 = dma.done.wait [#allocation5], 128  }
 0x108   :  { %327 = vsyncadd [#allocation5], 4294967168 }
 0x109   :  { %196 = vsyncpa [#allocation4], 1 }
 0x10a   :  { %197 = vsyncpa [#allocation7], 1 }
 0x10b   :  { %198 = vsyncpa [#allocation5], 1 }

</bundles_post_ra>
